<compile_context>
chip_gen: v5e
topology: v5e:2x2
jax: 0.10.0
libtpu: 0.0.40
codegen_flags: <defaults>
</compile_context>

<pallas_src>
import jax
import jax.numpy as jnp
from jax.experimental import pallas as pl
from jax.experimental.pallas import tpu as pltpu

_LANE = 128
_SUBLANE = 8


def _bce_dice_kernel(x_ref, t_ref, out_ref):
    """x_ref/t_ref: (N, TR, 128) input tiles (native dtype).

    out_ref: (4, N, 128) fp32 VMEM-resident accumulator (parallel dim squeezed):
      row 0: sum(sigmoid(x) * t)   row 1: sum(sigmoid(x))
      row 2: sum(t)                row 3: sum(elementwise BCE-with-logits)
    Sums are reduced over the sublane (TR) axis only; the wrapper finishes the
    128-lane reduction.
    """
    k = pl.program_id(1)

    @pl.when(k == 0)
    def _init():
        out_ref[...] = jnp.zeros_like(out_ref)

    x = x_ref[...].astype(jnp.float32)
    t = t_ref[...].astype(jnp.float32)

    # One exp per element, reused for both the softplus term and the sigmoid.
    e = jnp.exp(-jnp.abs(x))
    softplus = jnp.log1p(e)
    bce = jnp.maximum(x, 0.0) - x * t + softplus          # stable BCE-with-logits

    r = 1.0 / (1.0 + e)
    s = jnp.where(x >= 0.0, r, e * r)                      # sigmoid(x), no 2nd exp

    out_ref[0, :, :] += jnp.sum(s * t, axis=1)
    out_ref[1, :, :] += jnp.sum(s, axis=1)
    out_ref[2, :, :] += jnp.sum(t, axis=1)
    out_ref[3, :, :] += jnp.sum(bce, axis=1)


def bce_dice_loss(logits, target, *, block_bytes=1 << 20):
    n = logits.shape[0]
    x = logits.reshape(n, -1)          # keep native dtype; cast happens in-kernel
    t = target.reshape(n, -1)
    d = x.shape[1]

    # ---- tile the feature dim as lane-dense (rows, 128) slabs ---------------
    rows = pl.cdiv(d, _LANE)
    rows_aligned = pl.cdiv(rows, _SUBLANE) * _SUBLANE
    # rows per block: multiple of 8, ~block_bytes of fp32 per input block
    tr = max(_SUBLANE, (block_bytes // (n * _LANE * 4)) // _SUBLANE * _SUBLANE)
    tr = min(tr, rows_aligned)
    nb = pl.cdiv(rows, tr)             # total D-blocks
    num_par = 2 if nb >= 2 else 1      # feed both TensorCores on v7x
    kb = pl.cdiv(nb, num_par)          # inner ("arbitrary") blocks per chunk
    rows_pad = num_par * kb * tr
    d_pad = rows_pad * _LANE

    # ---- pad so padded elements contribute exactly zero ---------------------
    if d_pad != d:
        # big-negative logit: max(x,0)=0, x*t=0, exp(-|x|)=0, sigmoid(x)=0
        if jnp.issubdtype(x.dtype, jnp.floating):
            pad_val = -float(jnp.finfo(x.dtype).max) / 2
        else:
            pad_val = -(2 ** 30)
        x = jnp.pad(x, ((0, 0), (0, d_pad - d)), constant_values=pad_val)
        t = jnp.pad(t, ((0, 0), (0, d_pad - d)), constant_values=0)

    x = x.reshape(n, rows_pad, _LANE)
    t = t.reshape(n, rows_pad, _LANE)

    out = pl.pallas_call(
        _bce_dice_kernel,
        out_shape=jax.ShapeDtypeStruct((num_par, 4, n, _LANE), jnp.float32),
        grid=(num_par, kb),
        in_specs=[
            pl.BlockSpec((n, tr, _LANE), lambda p, k: (0, p * kb + k, 0)),
            pl.BlockSpec((n, tr, _LANE), lambda p, k: (0, p * kb + k, 0)),
        ],
        out_specs=pl.BlockSpec((None, 4, n, _LANE), lambda p, k: (p, 0, 0, 0)),
        compiler_params=pltpu.CompilerParams(
            dimension_semantics=("parallel", "arbitrary")),
    )(x, t)

    # ---- tiny epilogue in plain JAX -----------------------------------------
    sums = jnp.sum(out, axis=(0, 3))                 # (4, n): chunks + lanes
    inter, inp_s, tgt_s, bce_s = sums[0], sums[1], sums[2], sums[3]

    smooth = 1e-05
    bce = jnp.sum(bce_s) / (n * d)                   # mean over original elements
    dice = (2.0 * inter + smooth) / (inp_s + tgt_s + smooth)
    dice = 1.0 - jnp.sum(dice) / n
    return 0.5 * bce + dice


def _reference(logits, target):
    n = logits.shape[0]
    x = logits.reshape(n, -1).astype(jnp.float32)
    t = target.reshape(n, -1).astype(jnp.float32)
    bce = jnp.mean(jnp.maximum(x, 0.0) - x * t + jnp.log1p(jnp.exp(-jnp.abs(x))))
    s = jax.nn.sigmoid(x)
    smooth = 1e-05
    dice = (2.0 * jnp.sum(s * t, 1) + smooth) / (jnp.sum(s, 1) + jnp.sum(t, 1) + smooth)
    dice = 1.0 - jnp.sum(dice) / n
    return 0.5 * bce + dice


if __name__ == "__main__":
    key = jax.random.PRNGKey(0)
    k1, k2 = jax.random.split(key)
    # NCHW inputs, small shapes: batch=2, channels=4, spatial=16x16
    logits = jax.random.normal(k1, (2, 4, 16, 16), dtype=jnp.float32)
    target = (jax.random.uniform(k2, (2, 4, 16, 16)) > 0.5).astype(jnp.float32)

    out = bce_dice_loss(logits, target)
    out = jax.block_until_ready(out)

    ref = _reference(logits, target)
    assert jnp.allclose(out, ref, atol=1e-5, rtol=1e-5), (out, ref)
    print("KERNEL_OK")
</pallas_src>

<mosaic_0001>
module attributes {stable_mosaic.version = 11 : i64} {
  func.func @_bce_dice_kernel(%arg0: i32, %arg1: i32, %arg2: memref<2x8x128xf32, #tpu.memory_space<vmem>>, %arg3: memref<2x8x128xf32, #tpu.memory_space<vmem>>, %arg4: memref<1x4x2x128xf32, #tpu.memory_space<vmem>>) attributes {dimension_semantics = [#tpu.dimension_semantics<parallel>, #tpu.dimension_semantics<arbitrary>], iteration_bounds = array<i64: 1, 1>, scalar_prefetch = 0 : i64, scratch_operands = 0 : i64, tpu.core_type = #tpu.core_type<tc>, window_params = [{transform_indices = @transform_0, window_bounds = array<i64: 2, 8, 128>}, {transform_indices = @transform_1, window_bounds = array<i64: 2, 8, 128>}, {transform_indices = @transform_2, window_bounds = array<i64: 1, 4, 2, 128>}]} {
    %c0_i32 = arith.constant 0 : i32
    %0 = arith.cmpi eq, %arg1, %c0_i32 : i32
    %1 = arith.extui %0 : i1 to i32
    %c0_i32_0 = arith.constant 0 : i32
    %2 = arith.cmpi ne, %1, %c0_i32_0 : i32
    scf.if %2 {
      %cst_43 = arith.constant 0.000000e+00 : f32
      %52 = vector.broadcast %cst_43 : f32 to vector<4x2x128xf32>
      %c0_44 = arith.constant 0 : index
      %c0_45 = arith.constant 0 : index
      %c0_46 = arith.constant 0 : index
      %c0_47 = arith.constant 0 : index
      %53 = vector.load %arg4[%c0_44, %c0_45, %c0_46, %c0_47] : memref<1x4x2x128xf32, #tpu.memory_space<vmem>>, vector<1x4x2x128xf32>
      %54 = vector.shape_cast %53 : vector<1x4x2x128xf32> to vector<4x2x128xf32>
      %55 = vector.shape_cast %52 : vector<4x2x128xf32> to vector<1x4x2x128xf32>
      tpu.vector_store %arg4[%c0_44, %c0_45, %c0_46, %c0_47], %55 {strides = array<i32>} : memref<1x4x2x128xf32, #tpu.memory_space<vmem>>, vector<1x4x2x128xf32>,
    } else {
    }
    %c0 = arith.constant 0 : index
    %c0_1 = arith.constant 0 : index
    %c0_2 = arith.constant 0 : index
    %3 = vector.load %arg2[%c0, %c0_1, %c0_2] : memref<2x8x128xf32, #tpu.memory_space<vmem>>, vector<2x8x128xf32>
    %c0_3 = arith.constant 0 : index
    %c0_4 = arith.constant 0 : index
    %c0_5 = arith.constant 0 : index
    %4 = vector.load %arg3[%c0_3, %c0_4, %c0_5] : memref<2x8x128xf32, #tpu.memory_space<vmem>>, vector<2x8x128xf32>
    %5 = math.absf %3 : vector<2x8x128xf32>
    %cst = arith.constant 0.000000e+00 : f32
    %6 = vector.broadcast %cst : f32 to vector<2x8x128xf32>
    %7 = arith.subf %6, %5 : vector<2x8x128xf32>
    %8 = math.exp %7 : vector<2x8x128xf32>
    %9 = math.log1p %8 : vector<2x8x128xf32>
    %cst_6 = arith.constant 0.000000e+00 : f32
    %10 = vector.broadcast %cst_6 : f32 to vector<2x8x128xf32>
    %11 = arith.maximumf %3, %10 : vector<2x8x128xf32>
    %12 = arith.mulf %3, %4 : vector<2x8x128xf32>
    %13 = arith.subf %11, %12 : vector<2x8x128xf32>
    %14 = arith.addf %13, %9 : vector<2x8x128xf32>
    %cst_7 = arith.constant 1.000000e+00 : f32
    %15 = vector.broadcast %cst_7 : f32 to vector<2x8x128xf32>
    %16 = arith.addf %15, %8 : vector<2x8x128xf32>
    %cst_8 = arith.constant 1.000000e+00 : f32
    %17 = vector.broadcast %cst_8 : f32 to vector<2x8x128xf32>
    %18 = arith.divf %17, %16 : vector<2x8x128xf32>
    %cst_9 = arith.constant 0.000000e+00 : f32
    %19 = vector.broadcast %cst_9 : f32 to vector<2x8x128xf32>
    %20 = arith.cmpf oge, %3, %19 : vector<2x8x128xf32>
    %21 = arith.mulf %8, %18 : vector<2x8x128xf32>
    %22 = arith.select %20, %18, %21 : vector<2x8x128xi1>, vector<2x8x128xf32>
    %c0_10 = arith.constant 0 : index
    %c0_11 = arith.constant 0 : index
    %c0_12 = arith.constant 0 : index
    %c0_13 = arith.constant 0 : index
    %23 = vector.load %arg4[%c0_10, %c0_11, %c0_12, %c0_13] : memref<1x4x2x128xf32, #tpu.memory_space<vmem>>, vector<1x1x2x128xf32>
    %24 = vector.shape_cast %23 : vector<1x1x2x128xf32> to vector<2x128xf32>
    %25 = arith.mulf %22, %4 : vector<2x8x128xf32>
    %cst_14 = arith.constant dense<0.000000e+00> : vector<2x128xf32>
    %26 = vector.multi_reduction <add>, %25, %cst_14 [1] : vector<2x8x128xf32> to vector<2x128xf32>
    %27 = arith.addf %24, %26 : vector<2x128xf32>
    %c0_15 = arith.constant 0 : index
    %c0_16 = arith.constant 0 : index
    %c0_17 = arith.constant 0 : index
    %c0_18 = arith.constant 0 : index
    %28 = vector.load %arg4[%c0_15, %c0_16, %c0_17, %c0_18] : memref<1x4x2x128xf32, #tpu.memory_space<vmem>>, vector<1x1x2x128xf32>
    %29 = vector.shape_cast %28 : vector<1x1x2x128xf32> to vector<2x128xf32>
    %30 = vector.shape_cast %27 : vector<2x128xf32> to vector<1x1x2x128xf32>
    tpu.vector_store %arg4[%c0_15, %c0_16, %c0_17, %c0_18], %30 {strides = array<i32>} : memref<1x4x2x128xf32, #tpu.memory_space<vmem>>, vector<1x1x2x128xf32>,
    %c0_19 = arith.constant 0 : index
    %c1 = arith.constant 1 : index
    %c0_20 = arith.constant 0 : index
    %c0_21 = arith.constant 0 : index
    %31 = vector.load %arg4[%c0_19, %c1, %c0_20, %c0_21] : memref<1x4x2x128xf32, #tpu.memory_space<vmem>>, vector<1x1x2x128xf32>
    %32 = vector.shape_cast %31 : vector<1x1x2x128xf32> to vector<2x128xf32>
    %cst_22 = arith.constant dense<0.000000e+00> : vector<2x128xf32>
    %33 = vector.multi_reduction <add>, %22, %cst_22 [1] : vector<2x8x128xf32> to vector<2x128xf32>
    %34 = arith.addf %32, %33 : vector<2x128xf32>
    %c0_23 = arith.constant 0 : index
    %c1_24 = arith.constant 1 : index
    %c0_25 = arith.constant 0 : index
    %c0_26 = arith.constant 0 : index
    %35 = vector.load %arg4[%c0_23, %c1_24, %c0_25, %c0_26] : memref<1x4x2x128xf32, #tpu.memory_space<vmem>>, vector<1x1x2x128xf32>
    %36 = vector.shape_cast %35 : vector<1x1x2x128xf32> to vector<2x128xf32>
    %37 = vector.shape_cast %34 : vector<2x128xf32> to vector<1x1x2x128xf32>
    tpu.vector_store %arg4[%c0_23, %c1_24, %c0_25, %c0_26], %37 {strides = array<i32>} : memref<1x4x2x128xf32, #tpu.memory_space<vmem>>, vector<1x1x2x128xf32>,
    %c0_27 = arith.constant 0 : index
    %c2 = arith.constant 2 : index
    %c0_28 = arith.constant 0 : index
    %c0_29 = arith.constant 0 : index
    %38 = vector.load %arg4[%c0_27, %c2, %c0_28, %c0_29] : memref<1x4x2x128xf32, #tpu.memory_space<vmem>>, vector<1x1x2x128xf32>
    %39 = vector.shape_cast %38 : vector<1x1x2x128xf32> to vector<2x128xf32>
    %cst_30 = arith.constant dense<0.000000e+00> : vector<2x128xf32>
    %40 = vector.multi_reduction <add>, %4, %cst_30 [1] : vector<2x8x128xf32> to vector<2x128xf32>
    %41 = arith.addf %39, %40 : vector<2x128xf32>
    %c0_31 = arith.constant 0 : index
    %c2_32 = arith.constant 2 : index
    %c0_33 = arith.constant 0 : index
    %c0_34 = arith.constant 0 : index
    %42 = vector.load %arg4[%c0_31, %c2_32, %c0_33, %c0_34] : memref<1x4x2x128xf32, #tpu.memory_space<vmem>>, vector<1x1x2x128xf32>
    %43 = vector.shape_cast %42 : vector<1x1x2x128xf32> to vector<2x128xf32>
    %44 = vector.shape_cast %41 : vector<2x128xf32> to vector<1x1x2x128xf32>
    tpu.vector_store %arg4[%c0_31, %c2_32, %c0_33, %c0_34], %44 {strides = array<i32>} : memref<1x4x2x128xf32, #tpu.memory_space<vmem>>, vector<1x1x2x128xf32>,
    %c0_35 = arith.constant 0 : index
    %c3 = arith.constant 3 : index
    %c0_36 = arith.constant 0 : index
    %c0_37 = arith.constant 0 : index
    %45 = vector.load %arg4[%c0_35, %c3, %c0_36, %c0_37] : memref<1x4x2x128xf32, #tpu.memory_space<vmem>>, vector<1x1x2x128xf32>
    %46 = vector.shape_cast %45 : vector<1x1x2x128xf32> to vector<2x128xf32>
    %cst_38 = arith.constant dense<0.000000e+00> : vector<2x128xf32>
    %47 = vector.multi_reduction <add>, %14, %cst_38 [1] : vector<2x8x128xf32> to vector<2x128xf32>
    %48 = arith.addf %46, %47 : vector<2x128xf32>
    %c0_39 = arith.constant 0 : index
    %c3_40 = arith.constant 3 : index
    %c0_41 = arith.constant 0 : index
    %c0_42 = arith.constant 0 : index
    %49 = vector.load %arg4[%c0_39, %c3_40, %c0_41, %c0_42] : memref<1x4x2x128xf32, #tpu.memory_space<vmem>>, vector<1x1x2x128xf32>
    %50 = vector.shape_cast %49 : vector<1x1x2x128xf32> to vector<2x128xf32>
    %51 = vector.shape_cast %48 : vector<2x128xf32> to vector<1x1x2x128xf32>
    tpu.vector_store %arg4[%c0_39, %c3_40, %c0_41, %c0_42], %51 {strides = array<i32>} : memref<1x4x2x128xf32, #tpu.memory_space<vmem>>, vector<1x1x2x128xf32>,
    return
  }
  func.func @transform_0(%arg0: i32, %arg1: i32) -> (i32, i32, i32) {
    %c1_i32 = arith.constant 1 : i32
    %0 = arith.muli %arg0, %c1_i32 : i32
    %1 = arith.addi %0, %arg1 : i32
    %c0_i32 = arith.constant 0 : i32
    %c0_i32_0 = arith.constant 0 : i32
    %c0_i32_1 = arith.constant 0 : i32
    return %c0_i32, %1, %c0_i32_0 : i32, i32, i32
  }
  func.func @transform_1(%arg0: i32, %arg1: i32) -> (i32, i32, i32) {
    %c1_i32 = arith.constant 1 : i32
    %0 = arith.muli %arg0, %c1_i32 : i32
    %1 = arith.addi %0, %arg1 : i32
    %c0_i32 = arith.constant 0 : i32
    %c0_i32_0 = arith.constant 0 : i32
    %c0_i32_1 = arith.constant 0 : i32
    return %c0_i32, %1, %c0_i32_0 : i32, i32, i32
  }
  func.func @transform_2(%arg0: i32, %arg1: i32) -> (i32, i32, i32, i32) {
    %c0_i32 = arith.constant 0 : i32
    %c0_i32_0 = arith.constant 0 : i32
    %c0_i32_1 = arith.constant 0 : i32
    %c0_i32_2 = arith.constant 0 : i32
    return %arg0, %c0_i32, %c0_i32_0, %c0_i32_1 : i32, i32, i32, i32
  }
}

</mosaic_0001>

<bundles_post_ra>
// kernel: tpu_custom_call.1
= control target key start
LH: loop header
LB: loop body
LE: loop exit
PB: predicated region body
PF: predicated region fallthrough
CT: control target
= control target key end

     0   :  { %7 = vsyncpa [#allocation3], 0  ;;  %s424_s0 = inlined_call_operand.hbm [shape: f32[2,8,128], index: 0, kind: input, shape index: {}]   ;;  %s425_s1 = inlined_call_operand.hbm [shape: f32[2,8,128], index: 1, kind: input, shape index: {}]   ;;  %s426_s2 = inlined_call_operand.hbm [shape: f32[1,4,2,128], index: 2, kind: output, shape index: {}]  }
   0x1   :  { %8 = vsyncpa [#allocation6], 0 }
   0x2   :  { %9 = vsyncpa [#allocation4], 0  ;;  %s17_s11 = sshll.u32 %s424_s0, 4  ;;  %s336_s12 = smov [#allocation2]   ;;  %s18_s11 = int_to_ptr.hbm [resolvable:$true] %s17_s11 }
   0x3   :  { %s19_s13 = sshll.u32 %s336_s12, 4  ;;  %s33_s16 = sshll.u32 %s425_s1, 4  ;;  %s20_s13 = int_to_ptr.vmem [resolvable:$true] %s19_s13  ;;  %s34_s16 = int_to_ptr.hbm [resolvable:$true] %s33_s16 }
   0x4   :  { %s337_s17 = smov 128   ;;  %s338_s18 = smov 8  }
   0x5   :  { %25 = dma.hbm_to_vmem [thread:$0]  %s18_s11, 256, %s20_s13, [#allocation3], %s337_s17, %s337_s17, %s338_s18  }
   0x6   :  { %s339_s19 = smov [#allocation5]  }
   0x7   :  { %s35_s20 = sshll.u32 %s339_s19, 4  ;;  %s36_s20 = int_to_ptr.vmem [resolvable:$true] %s35_s20 }
   0x8   :  { %41 = dma.hbm_to_vmem [thread:$0]  %s34_s16, 256, %s36_s20, [#allocation6], %s337_s17, %s337_s17, %s338_s18  }
   0x9   :  { %330 = dma.done.wait [#allocation3], 256  }
   0xa   :  { %331 = vsyncadd [#allocation3], 4294967040 }
   0xb   :  { %332 = dma.done.wait [#allocation6], 256  }
   0xc   :  { %333 = vsyncadd [#allocation6], 4294967040  ;;  %v340_v0 = vmov 0.0   ;;  %v365_v1 = vld [vmem:[#allocation2] sm:$0xff]  ;;  %v367_v2 = vld [vmem:[#allocation2 + $0x8] sm:$0xff]  ;;  %vm153_vm0 = vcmask 1041409  }
   0xd   :  { %56 = vst [vmem:[#allocation7] sm:$0x3] %v340_v0  ;;  %v64_v3 = vand.u32 2147483647, %v365_v1  ;;  %v65_v4 = vand.u32 2147483647, %v367_v2 }
   0xe   :  { %57 = vst [vmem:[#allocation7 + $0x2] sm:$0x3] %v340_v0  ;;  %v371_v9 = vld [vmem:[#allocation5] sm:$0xff]  ;;  %v373_v10 = vld [vmem:[#allocation5 + $0x8] sm:$0xff]  ;;  %v90_v27 = vmax.f32 %v365_v1, 0.0  ;;  %v91_v30 = vmax.f32 %v367_v2, 0.0 }
   0xf   :  { %58 = vst [vmem:[#allocation7 + $0x4] sm:$0x3] %v340_v0  ;;  %v66_v5 = vsub.f32 0.0, %v64_v3  ;;  %v67_v6 = vsub.f32 0.0, %v65_v4  ;;  %v180_v11 = vrot.slane %v371_v9, 4  ;;  %v186_v12 = vrot.slane %v373_v10, 4 }
  0x10   :  { %59 = vst [vmem:[#allocation7 + $0x6] sm:$0x3] %v340_v0  ;;  %v92_v28 = vmul.f32 %v371_v9, %v365_v1  ;;  %v93_v31 = vmul.f32 %v373_v10, %v367_v2  ;;  %vm130_vm11 = vcmp.ge.f32.partialorder %v365_v1, 0.0  ;;  %vm131_vm12 = vcmp.ge.f32.partialorder %v367_v2, 0.0  ;;  %s341_s0 = smov [#allocation7]   ;;  %s224_s23 = sshll.u32 %s426_s2, 4  ;;  %s225_s23 = int_to_ptr.hbm [resolvable:$true] %s224_s23 }
  0x11   :  { %v68_v7 = vmul.f32 1.442695, %v66_v5  ;;  %v70_v8 = vmul.f32 1.442695, %v67_v6  ;;  %v181_v13 = vadd.f32 %v180_v11, %v371_v9  ;;  %v187_v14 = vadd.f32 %v186_v12, %v373_v10  ;;  %s222_s1 = sshll.u32 %s341_s0, 4  ;;  %s342_s24 = smov 32   ;;  %s223_s1 = int_to_ptr.vmem [resolvable:$true] %s222_s1 }
  0x12   :  { %v94_v38 = vsub.f32 %v90_v27, %v92_v28  ;;  %v95_v42 = vsub.f32 %v91_v30, %v93_v31  ;;  %s343_s25 = smov 2  }
  0x13   :  { %246 = vpow2.f32 %v68_v7  ;;  %v182_v15 = vrot.slane %v181_v13, 2  ;;  %v188_v16 = vrot.slane %v187_v14, 2 }
  0x14   :  { %248 = vpow2.f32 %v70_v8 }
  0x15   :  { %v183_v18 = vadd.f32 %v182_v15, %v181_v13  ;;  %v189_v19 = vadd.f32 %v188_v16, %v187_v14 }
  0x16   :  { %v179_v32 = vld [vmem:[#allocation7 + $0x4] sm:$0x3] }
  0x17   :  { %v184_v23 = vrot.slane %v183_v18, 1  ;;  %v190_v24 = vrot.slane %v189_v19, 1 }
  0x19   :  { %v379_v17 = vpop.eup %246  ;;  %v185_v29 = vadd.f32 %v184_v23, %v183_v18  ;;  %v191_v33 = vadd.f32 %v190_v24, %v189_v19 }
  0x1a   :  { %v381_v20 = vpop.eup %248  ;;  %v72_v21 = vadd.f32 1.0, %v379_v17  ;;  %v75_v25 = vmul.f32 -0.5, %v379_v17  ;;  %v78_v36 = vand.u32 2147483647, %v379_v17 }
  0x1b   :  { %v81_v22 = vadd.f32 1.0, %v381_v20  ;;  %v84_v26 = vmul.f32 -0.5, %v381_v20  ;;  %v194_v35 = vsel %vm153_vm0, %v191_v33, %v185_v29  ;;  %v87_v41 = vand.u32 2147483647, %v381_v20 }
  0x1c   :  { %250 = vrcp.f32 %v72_v21  ;;  %v76_v34 = vadd.f32 1.0, %v75_v25  ;;  %vm105_vm1 = vweird.f32 %v72_v21  ;;  %v196_v40 = vadd.f32 %v194_v35, %v179_v32 }
  0x1d   :  { %252 = vrcp.f32 %v81_v22  ;;  %v85_v37 = vadd.f32 1.0, %v84_v26  ;;  %v109_v45 = vand.u32 2147483647, %v72_v21  ;;  %v111_v46 = vand.u32 2147483648, %v72_v21 }
  0x1e   :  { %254 = vlog2.f32 %v72_v21  ;;  %vm120_vm2 = vweird.f32 %v81_v22  ;;  %v124_v48 = vand.u32 2147483647, %v81_v22  ;;  %v126_v49 = vand.u32 2147483648, %v81_v22  ;;  %197 = vst [vmem:[#allocation7 + $0x4] sm:$0x3] %v196_v40 }
  0x1f   :  { %256 = vlog2.f32 %v81_v22  ;;  %v77_v50 = vmul.f32 %v379_v17, %v76_v34  ;;  %vm397_vm4 = vcmp.lt.f32.partialorder %v78_v36, 0.0004427343  ;;  %v86_v54 = vmul.f32 %v381_v20, %v85_v37  ;;  %v199_v40 = vld [vmem:[#allocation7 + $0x6] sm:$0x3] }
  0x20   :  { %vm88_vm6 = vcmp.lt.f32.partialorder %v87_v41, 0.0004427343  ;;  %vm110_vm8 = vcmp.eq.f32.partialorder %v109_v45, 8.507059e+37  ;;  %v112_v61 = vor.u32 1.1754944e-38, %v111_v46  ;;  %v127_v3 = vor.u32 1.1754944e-38, %v126_v49 }
  0x21   :  { %vm125_vm10 = vcmp.eq.f32.partialorder %v124_v48, 8.507059e+37 }
  0x22   :  { %v251_v39 = vpop.eup %250 }
  0x23   :  { %v253_v43 = vpop.eup %252  ;;  %v101_v44 = vmul.f32 %v251_v39, %v72_v21  ;;  %vm106_vm3 = vweird.f32 %v251_v39 }
  0x24   :  { %v116_v47 = vmul.f32 %v253_v43, %v81_v22  ;;  %v255_v51 = vpop.eup %254  ;;  %vm121_vm5 = vweird.f32 %v253_v43  ;;  %vm403_vm7 = vmor %vm105_vm1, %vm106_vm3 }
  0x25   :  { %v102_v52 = vsub.f32 1.0, %v101_v44  ;;  %v257_v55 = vpop.eup %256  ;;  %v74_v57 = vmul.f32 0.6931472, %v255_v51  ;;  %vm122_vm9 = vmor %vm120_vm2, %vm121_vm5 }
  0x26   :  { %v117_v56 = vsub.f32 1.0, %v116_v47  ;;  %v83_v59 = vmul.f32 0.6931472, %v257_v55  ;;  %v136_v55 = vld [vmem:[#allocation7] sm:$0x3] }
  0x27   :  { %v103_v58 = vmul.f32 %v251_v39, %v102_v52  ;;  %v80_v63 = vsel %vm397_vm4, %v77_v50, %v74_v57  ;;  %v159_v52 = vld [vmem:[#allocation7 + $0x2] sm:$0x3] }
  0x28   :  { %v118_v62 = vmul.f32 %v253_v43, %v117_v56  ;;  %v89_v4 = vsel %vm88_vm6, %v86_v54, %v83_v59  ;;  %v96_v5 = vadd.f32 %v94_v38, %v80_v63 }
  0x29   :  { %v104_v0 = vadd.f32 %v251_v39, %v103_v58  ;;  %v97_v7 = vadd.f32 %v95_v42, %v89_v4 }
  0x2a   :  { %v119_v6 = vadd.f32 %v253_v43, %v118_v62  ;;  %v200_v11 = vrot.slane %v96_v5, 4 }
  0x2b   :  { %v108_v8 = vsel %vm403_vm7, %v251_v39, %v104_v0  ;;  %v206_v14 = vrot.slane %v97_v7, 4 }
  0x2c   :  { %v113_v12 = vsel %vm110_vm8, %v112_v61, %v108_v8  ;;  %v123_v13 = vsel %vm122_vm9, %v253_v43, %v119_v6  ;;  %v201_v18 = vadd.f32 %v200_v11, %v96_v5 }
  0x2d   :  { %v128_v15 = vsel %vm125_vm10, %v127_v3, %v123_v13  ;;  %v132_v16 = vmul.f32 %v379_v17, %v113_v12  ;;  %v207_v21 = vadd.f32 %v206_v14, %v97_v7 }
  0x2e   :  { %v133_v19 = vmul.f32 %v381_v20, %v128_v15  ;;  %v202_v23 = vrot.slane %v201_v18, 2 }
  0x2f   :  { %v134_v22 = vsel %vm130_vm11, %v113_v12, %v132_v16  ;;  %v208_v27 = vrot.slane %v207_v21, 2 }
  0x30   :  { %v135_v24 = vsel %vm131_vm12, %v128_v15, %v133_v19  ;;  %v137_v25 = vmul.f32 %v134_v22, %v371_v9  ;;  %v160_v26 = vrot.slane %v134_v22, 4  ;;  %v203_v29 = vadd.f32 %v202_v23, %v201_v18 }
  0x31   :  { %v138_v28 = vmul.f32 %v135_v24, %v373_v10  ;;  %v166_v1 = vrot.slane %v135_v24, 4  ;;  %v209_v2 = vadd.f32 %v208_v27, %v207_v21 }
  0x32   :  { %v139_v30 = vrot.slane %v137_v25, 4  ;;  %v161_v31 = vadd.f32 %v160_v26, %v134_v22  ;;  %v204_v33 = vrot.slane %v203_v29, 1 }
  0x33   :  { %v145_v32 = vrot.slane %v138_v28, 4  ;;  %v167_v17 = vadd.f32 %v166_v1, %v135_v24  ;;  %v210_v35 = vrot.slane %v209_v2, 1 }
  0x34   :  { %v140_v34 = vadd.f32 %v139_v30, %v137_v25  ;;  %v162_v20 = vrot.slane %v161_v31, 2  ;;  %v205_v38 = vadd.f32 %v204_v33, %v203_v29 }
  0x35   :  { %v146_v36 = vadd.f32 %v145_v32, %v138_v28  ;;  %v168_v37 = vrot.slane %v167_v17, 2  ;;  %v211_v41 = vadd.f32 %v210_v35, %v209_v2 }
  0x36   :  { %v141_v39 = vrot.slane %v140_v34, 2  ;;  %v163_v9 = vadd.f32 %v162_v20, %v161_v31 }
  0x37   :  { %v147_v42 = vrot.slane %v146_v36, 2  ;;  %v169_v10 = vadd.f32 %v168_v37, %v167_v17  ;;  %v214_v45 = vsel %vm153_vm0, %v211_v41, %v205_v38 }
  0x38   :  { %v142_v43 = vadd.f32 %v141_v39, %v140_v34  ;;  %v164_v44 = vrot.slane %v163_v9, 1  ;;  %v216_v48 = vadd.f32 %v214_v45, %v199_v40 }
  0x39   :  { %v148_v46 = vadd.f32 %v147_v42, %v146_v36  ;;  %v170_v47 = vrot.slane %v169_v10, 1 }
  0x3a   :  { %v143_v49 = vrot.slane %v142_v43, 1  ;;  %v165_v50 = vadd.f32 %v164_v44, %v163_v9  ;;  %217 = vst [vmem:[#allocation7 + $0x6] sm:$0x3] %v216_v48 }
  0x3b   :  { %v149_v51 = vrot.slane %v148_v46, 1  ;;  %v171_v53 = vadd.f32 %v170_v47, %v169_v10 }
  0x3c   :  { %v144_v54 = vadd.f32 %v143_v49, %v142_v43 }
  0x3d   :  { %v150_v56 = vadd.f32 %v149_v51, %v148_v46  ;;  %v174_v57 = vsel %vm153_vm0, %v171_v53, %v165_v50 }
  0x3e   :  { %v176_v58 = vadd.f32 %v174_v57, %v159_v52 }
  0x3f   :  { %v154_v59 = vsel %vm153_vm0, %v150_v56, %v144_v54 }
  0x40   :  { %v156_v60 = vadd.f32 %v154_v59, %v136_v55  ;;  %177 = vst [vmem:[#allocation7 + $0x2] sm:$0x3] %v176_v58 }
  0x42   :  { %157 = vst [vmem:[#allocation7] sm:$0x3] %v156_v60 }
  0x43   :  { %230 = dma.vmem_to_hbm [thread:$0]  %s223_s1, 128, %s225_s23, [#allocation4], %s342_s24, %s342_s24, %s343_s25  }
  0x44   :  { %334 = dma.done.wait [#allocation4], 128  }
  0x45   :  { %335 = vsyncadd [#allocation4], 4294967168 }
  0x46   :  { %235 = vsyncpa [#allocation3], 1 }
  0x47   :  { %236 = vsyncpa [#allocation6], 1 }
  0x48   :  { %237 = vsyncpa [#allocation4], 1 }

</bundles_post_ra>
